<compile_context>
chip_gen: v7x
topology: tpu7x:2x2x1
jax: 0.10.0
libtpu: 0.0.40
codegen_flags: <defaults>
</compile_context>

<pallas_src>
import functools

import jax
import jax.numpy as jnp
from jax.experimental import pallas as pl
from jax.experimental.pallas import tpu as pltpu


def _compute_vmem_limit():
    try:
        info = pltpu.get_tpu_info()
        cap = int(getattr(info, "vmem_capacity_bytes", 64 * 1024 * 1024))
    except Exception:
        cap = 64 * 1024 * 1024          # conservative (v7x physical)
    # ~62% of physical: 40 MiB on v7x (64 MiB), 80 MiB on v5e/v6e (128 MiB)
    return min(cap * 5 // 8, 96 * 1024 * 1024)


_VMEM_LIMIT = _compute_vmem_limit()


def _cparams(*sem):
    return pltpu.CompilerParams(dimension_semantics=sem,
                                vmem_limit_bytes=_VMEM_LIMIT)


def _act(y, kind):
    # y is f32; exp/reciprocal land on the EUP slot (approx recip = vrcp).
    if kind == "silu":
        return y * pl.reciprocal(1.0 + jnp.exp(-y), approx=True)
    if kind == "sigmoid":
        return pl.reciprocal(1.0 + jnp.exp(-y), approx=True)
    if kind == "relu":
        return jnp.maximum(y, 0.0)
    return y


# ---------------------------------------------------------------------------
# Pallas kernels
# ---------------------------------------------------------------------------
def _mm_kernel(act, x_ref, w_ref, b_ref, o_ref):
    # act((x @ w) + b); BN scale already folded into w. bf16 in, f32 acc.
    y = jnp.dot(x_ref[...], w_ref[...], preferred_element_type=jnp.float32)
    y = y + b_ref[...]
    o_ref[...] = _act(y, act).astype(o_ref.dtype)


def _dw_kernel(k, s, H2, act, x_ref, w_ref, b_ref, o_ref, pool_ref):
    # x_ref : (1, s*s*H2, W2, C) bf16 -- padded input, stride phases stacked
    #         along the row axis (phase-major), one batch element.
    # w_ref : (k*k, C) f32, BN scale folded.  b_ref: (1, C) f32.
    # o_ref : (1, Ho, Wo, C) bf16;  pool_ref: (1, 1, C) f32 spatial mean (SE).
    Ho, Wo = o_ref.shape[1], o_ref.shape[2]
    w = w_ref[...]
    acc = None
    for ki in range(k):
        qi, pi = ki // s, ki % s
        for kj in range(k):
            qj, pj = kj // s, kj % s
            r0 = (pi * s + pj) * H2 + qi
            tap = x_ref[0, r0:r0 + Ho, qj:qj + Wo, :].astype(jnp.float32)
            term = tap * w[ki * k + kj]
            acc = term if acc is None else acc + term   # in-place f32 accumulate
    y = _act(acc + b_ref[...], act)
    pool_ref[...] = jnp.mean(y, axis=(0, 1), keepdims=True)
    o_ref[0] = y.astype(o_ref.dtype)


def _proj_se_kernel(x_ref, p_ref, w1_ref, b1_ref, w2_ref, b2_ref,
                    wp_ref, bp_ref, o_ref):
    # Fused squeeze-excitation (two tiny FCs) + channel gate + 1x1 projection.
    # x_ref: (1, HW, C) bf16; p_ref: (1, 1, C) f32 pooled activation.
    pooled = p_ref[0]                                               # (1, C) f32
    h = jnp.dot(pooled.astype(jnp.bfloat16), w1_ref[...],
                preferred_element_type=jnp.float32) + b1_ref[...]
    h = _act(h, "silu")
    g = jnp.dot(h.astype(jnp.bfloat16), w2_ref[...],
                preferred_element_type=jnp.float32) + b2_ref[...]
    g = _act(g, "sigmoid")                                          # (1, C)
    xs = (x_ref[0].astype(jnp.float32) * g).astype(jnp.bfloat16)    # gated x
    y = jnp.dot(xs, wp_ref[...], preferred_element_type=jnp.float32)
    y = y + bp_ref[...]
    o_ref[0] = y.astype(o_ref.dtype)                                # no act


def _mlp_kernel(acts, x_ref, *refs):
    # All classifier Linear layers fused in one kernel (M=batch is tiny).
    o_ref = refs[-1]
    h = x_ref[...]
    for li, act in enumerate(acts):
        w = refs[2 * li][...]
        b = refs[2 * li + 1][...]
        y = jnp.dot(h.astype(jnp.bfloat16), w,
                    preferred_element_type=jnp.float32) + b
        h = _act(y, act)
    o_ref[...] = h.astype(o_ref.dtype)


# ---------------------------------------------------------------------------
# Layer helpers (glue + Pallas calls)
# ---------------------------------------------------------------------------
def matmul_fused(x, w, b, act="none", out_dtype=jnp.bfloat16):
    """act(x @ w + b).  x:(M,K) -> bf16, w:(K,N) bf16 (BN folded), b:(N,) f32."""
    M, K = x.shape
    N = w.shape[1]
    x = x.astype(jnp.bfloat16)
    tm = M if M <= 512 else 512          # full-M block for small M (no pad copy)
    grid_m = pl.cdiv(M, tm)
    return pl.pallas_call(
        functools.partial(_mm_kernel, act),
        out_shape=jax.ShapeDtypeStruct((M, N), out_dtype),
        grid=(grid_m,),
        in_specs=[
            pl.BlockSpec((tm, K), lambda i: (i, 0)),
            pl.BlockSpec((K, N), lambda i: (0, 0)),
            pl.BlockSpec((1, N), lambda i: (0, 0)),
        ],
        out_specs=pl.BlockSpec((tm, N), lambda i: (i, 0)),
        compiler_params=_cparams("parallel"),
    )(x, w, b.reshape(1, N))


def conv1x1_bn_act(x, w, b, act):
    N, H, W, C = x.shape
    y = matmul_fused(x.reshape(N * H * W, C), w, b, act)
    return y.reshape(N, H, W, w.shape[1])


def stem_conv(x, w, b):
    # 3x3 s2 conv on the 3-channel input: im2col in glue (tiny) + fused matmul.
    N, H, W, C = x.shape
    k, s, p = 3, 2, 1
    xp = jnp.pad(x, ((0, 0), (p, p), (p, p), (0, 0)))
    Ho = (H + 2 * p - k) // s + 1
    Wo = (W + 2 * p - k) // s + 1
    taps = [xp[:, i:i + s * (Ho - 1) + 1:s, j:j + s * (Wo - 1) + 1:s, :]
            for i in range(k) for j in range(k)]
    # patch order (c, ki, kj) matches torch_weight.reshape(Cout, Cin*k*k).T
    patches = jnp.stack(taps, axis=-1).reshape(N * Ho * Wo, C * k * k)
    y = matmul_fused(patches, w, b, "silu")
    return y.reshape(N, Ho, Wo, w.shape[1])


def depthwise_bn_act(x, w, b, k, stride, act):
    """Depthwise kxk conv + BN(+folded scale) + act; also returns SE pool."""
    N, H, W, C = x.shape
    pd = (k - 1) // 2
    s = stride
    Ho = (H + 2 * pd - k) // s + 1
    Wo = (W + 2 * pd - k) // s + 1
    xp = jnp.pad(x, ((0, 0), (pd, pd), (pd, pd), (0, 0)))
    Hp, Wp = H + 2 * pd, W + 2 * pd
    if s == 1:
        x4, H2, W2 = xp, Hp, Wp
    else:
        # stride-phase rearrangement so all in-kernel tap slices are contiguous
        assert Hp % s == 0 and Wp % s == 0
        H2, W2 = Hp // s, Wp // s
        x4 = xp.reshape(N, H2, s, W2, s, C).transpose(0, 2, 4, 1, 3, 5)
        x4 = x4.reshape(N, s * s * H2, W2, C)
    # TODO(synk): for large resolutions, additionally tile over H with a halo;
    # at these spatial sizes a whole padded image per batch element fits VMEM.
    out, pooled = pl.pallas_call(
        functools.partial(_dw_kernel, k, s, H2, act),
        out_shape=(jax.ShapeDtypeStruct((N, Ho, Wo, C), jnp.bfloat16),
                   jax.ShapeDtypeStruct((N, 1, C), jnp.float32)),
        grid=(N,),
        in_specs=[
            pl.BlockSpec((1, x4.shape[1], W2, C), lambda n: (n, 0, 0, 0)),
            pl.BlockSpec((k * k, C), lambda n: (0, 0)),
            pl.BlockSpec((1, C), lambda n: (0, 0)),
        ],
        out_specs=(pl.BlockSpec((1, Ho, Wo, C), lambda n: (n, 0, 0, 0)),
                   pl.BlockSpec((1, 1, C), lambda n: (n, 0, 0))),
        compiler_params=_cparams("parallel"),
    )(x4, w, b.reshape(1, C))
    return out, pooled


def project_se(x, pooled, p):
    """Fused SE-FC1/FC2 + channel gate + 1x1 projection conv (BN folded)."""
    N, H, W, C = x.shape
    Cout = p["pw"].shape[1]
    sq = p["se_w1"].shape[1]
    out = pl.pallas_call(
        _proj_se_kernel,
        out_shape=jax.ShapeDtypeStruct((N, H * W, Cout), jnp.bfloat16),
        grid=(N,),
        in_specs=[
            pl.BlockSpec((1, H * W, C), lambda n: (n, 0, 0)),
            pl.BlockSpec((1, 1, C), lambda n: (n, 0, 0)),
            pl.BlockSpec((C, sq), lambda n: (0, 0)),
            pl.BlockSpec((1, sq), lambda n: (0, 0)),
            pl.BlockSpec((sq, C), lambda n: (0, 0)),
            pl.BlockSpec((1, C), lambda n: (0, 0)),
            pl.BlockSpec((C, Cout), lambda n: (0, 0)),
            pl.BlockSpec((1, Cout), lambda n: (0, 0)),
        ],
        out_specs=pl.BlockSpec((1, H * W, Cout), lambda n: (n, 0, 0)),
        compiler_params=_cparams("parallel"),
    )(x.reshape(N, H * W, C), pooled,
      p["se_w1"], p["se_b1"].reshape(1, sq),
      p["se_w2"], p["se_b2"].reshape(1, C),
      p["pw"], p["pb"].reshape(1, Cout))
    return out.reshape(N, H, W, Cout)


def mbconv(x, p):
    h = x
    if p["expand"] != 1:
        h = conv1x1_bn_act(h, p["ew"], p["eb"], "silu")
    h, pooled = depthwise_bn_act(h, p["dw"], p["db"], p["k"], p["stride"], "silu")
    h = project_se(h, pooled, p)
    if p["stride"] == 1 and p["in"] == p["out"]:
        # residual; StochasticDepth is identity in eval mode (plain-JAX glue)
        h = h + x
    return h


def adaptive_avg_pool_7x7(x):
    # PyTorch AdaptiveAvgPool2d((7,7)) semantics (glue; tiny reduction)
    N, H, W, C = x.shape
    rows = []
    for i in range(7):
        hs, he = (i * H) // 7, ((i + 1) * H + 6) // 7
        cols = []
        for j in range(7):
            ws, we = (j * W) // 7, ((j + 1) * W + 6) // 7
            cols.append(jnp.mean(x[:, hs:he, ws:we, :], axis=(1, 2)))
        rows.append(jnp.stack(cols, axis=1))
    return jnp.stack(rows, axis=1)                      # (N, 7, 7, C)


def mlp_head(x, layers):
    # x: (N, feat) f32/bf16; layers: list of (w_bf16, b_f32, act)
    N, K = x.shape
    acts = tuple(a for (_, _, a) in layers)
    n_out = layers[-1][0].shape[1]
    in_specs = [pl.BlockSpec((N, K), lambda i: (0, 0))]
    args = [x.astype(jnp.bfloat16)]
    for (w, b, _) in layers:
        in_specs.append(pl.BlockSpec(w.shape, lambda i: (0, 0)))
        in_specs.append(pl.BlockSpec((1, b.shape[0]), lambda i: (0, 0)))
        args.append(w)
        args.append(b.reshape(1, -1))
    return pl.pallas_call(
        functools.partial(_mlp_kernel, acts),
        out_shape=jax.ShapeDtypeStruct((N, n_out), jnp.float32),
        grid=(1,),
        in_specs=in_specs,
        out_specs=pl.BlockSpec((N, n_out), lambda i: (0, 0)),
        compiler_params=_cparams("arbitrary"),
    )(*args)


# ---------------------------------------------------------------------------
# Parameters (deterministic, synthetic; BatchNorm scale folded into weights)
# ---------------------------------------------------------------------------
STAGES = [
    # (expand, kernel, stride, in_ch, out_ch, num_blocks)  -- EfficientNet-B0
    (1, 3, 1, 32, 16, 1),
    (6, 3, 2, 16, 24, 2),
    (6, 5, 2, 24, 40, 2),
    (6, 3, 2, 40, 80, 3),
    (6, 5, 1, 80, 112, 3),
    (6, 5, 2, 112, 192, 4),
    (6, 3, 1, 192, 320, 1),
]


class ParamGen:
    def __init__(self, seed):
        self._key = jax.random.PRNGKey(seed)

    def _take(self):
        self._key, k = jax.random.split(self._key)
        return k

    def _w(self, shape, fan_in):
        return jax.random.normal(self._take(), shape, jnp.float32) / jnp.sqrt(float(fan_in))

    def _bn(self, c):
        scale = 1.0 + 0.05 * jax.random.normal(self._take(), (c,), jnp.float32)
        bias = 0.05 * jax.random.normal(self._take(), (c,), jnp.float32)
        return scale, bias

    def conv_bn(self, shape):
        # conv weight (K, Cout) with BN scale folded in; stored bf16 for the MXU
        w = self._w(shape, shape[0])
        s, b = self._bn(shape[1])
        return (w * s[None, :]).astype(jnp.bfloat16), b

    def dw_bn(self, kk, c):
        # depthwise weight (k*k, C) f32 (VPU path), BN scale folded in
        w = self._w((kk, c), kk)
        s, b = self._bn(c)
        return w * s[None, :], b

    def linear(self, cin, cout):
        w = self._w((cin, cout), cin).astype(jnp.bfloat16)
        b = 0.01 * jax.random.normal(self._take(), (cout,), jnp.float32)
        return w, b


def init_params(pg, hidden_size, num_layers, num_classes):
    params = {}
    # stem: Conv 3->32, k3 s2, BN, SiLU  (im2col weight (27, 32))
    params["stem_w"], params["stem_b"] = pg.conv_bn((27, 32))
    blocks = []
    for (expand, k, stride, c_in, c_out, n) in STAGES:
        for bi in range(n):
            ic = c_in if bi == 0 else c_out
            st = stride if bi == 0 else 1
            ec = ic * expand
            sq = max(1, ic // 4)
            p = {"expand": expand, "k": k, "stride": st, "in": ic, "out": c_out}
            if expand != 1:
                p["ew"], p["eb"] = pg.conv_bn((ic, ec))
            p["dw"], p["db"] = pg.dw_bn(k * k, ec)
            p["se_w1"], p["se_b1"] = pg.linear(ec, sq)
            p["se_w2"], p["se_b2"] = pg.linear(sq, ec)
            p["pw"], p["pb"] = pg.conv_bn((ec, c_out))
            blocks.append(p)
    params["blocks"] = blocks
    # head: Conv 320->1280 1x1, BN, SiLU
    params["head_w"], params["head_b"] = pg.conv_bn((320, 1280))
    # classifier (num_layers > 1 branch of the PyTorch module)
    feat = 1280 * 7 * 7
    cls = [(*pg.linear(feat, hidden_size), "relu")]
    for _ in range(num_layers - 1):
        cls.append((*pg.linear(hidden_size, hidden_size), "relu"))
    cls.append((*pg.linear(hidden_size, num_classes), "none"))
    params["classifier"] = cls
    return params


# ---------------------------------------------------------------------------
# Forward pass (EfficientNetPT.forward semantics, eval mode)
# ---------------------------------------------------------------------------
def forward(params, x_nchw):
    x = jnp.transpose(x_nchw, (0, 2, 3, 1)).astype(jnp.bfloat16)   # NCHW -> NHWC
    # features
    x = stem_conv(x, params["stem_w"], params["stem_b"])
    for blk in params["blocks"]:
        x = mbconv(x, blk)
    x = conv1x1_bn_act(x, params["head_w"], params["head_b"], "silu")
    # classifier
    x = adaptive_avg_pool_7x7(x.astype(jnp.float32))               # (N, 7, 7, 1280)
    x = jnp.transpose(x, (0, 3, 1, 2)).reshape(x.shape[0], -1)     # torch NCHW flatten order
    # TODO(synk): Dropout treated as eval-mode identity (inference semantics).
    return mlp_head(x, params["classifier"])


if __name__ == "__main__":
    IN_CHANNELS, HIDDEN, NUM_LAYERS, NUM_CLASSES = 3, 32, 2, 10
    pg = ParamGen(0)
    params = init_params(pg, HIDDEN, NUM_LAYERS, NUM_CLASSES)

    x = jax.random.normal(jax.random.PRNGKey(0), (2, IN_CHANNELS, 64, 64), jnp.float32)
    out = forward(params, x)
    out = jax.block_until_ready(out)

    assert out.shape == (2, NUM_CLASSES), out.shape
    assert bool(jnp.all(jnp.isfinite(out)))
    print("KERNEL_OK")
</pallas_src>

<mosaic_0001>
module attributes {stable_mosaic.version = 11 : i64} {
  func.func @_mm_kernel(%arg0: i32, %arg1: memref<512x27xbf16, #tpu.memory_space<vmem>>, %arg2: memref<27x32xbf16, #tpu.memory_space<vmem>>, %arg3: memref<1x32xf32, #tpu.memory_space<vmem>>, %arg4: memref<512x32xbf16, #tpu.memory_space<vmem>>) attributes {dimension_semantics = [#tpu.dimension_semantics<parallel>], iteration_bounds = array<i64: 4>, scalar_prefetch = 0 : i64, scratch_operands = 0 : i64, tpu.core_type = #tpu.core_type<tc>, window_params = [{transform_indices = @transform_0, window_bounds = array<i64: 512, 27>}, {pipeline_mode = #tpu.pipeline_mode<synchronous>, transform_indices = @transform_1, window_bounds = array<i64: 27, 32>}, {pipeline_mode = #tpu.pipeline_mode<synchronous>, transform_indices = @transform_2, window_bounds = array<i64: 1, 32>}, {transform_indices = @transform_3, window_bounds = array<i64: 512, 32>}]} {
    %c0 = arith.constant 0 : index
    %c0_0 = arith.constant 0 : index
    %0 = vector.load %arg1[%c0, %c0_0] : memref<512x27xbf16, #tpu.memory_space<vmem>>, vector<512x27xbf16>
    %c0_1 = arith.constant 0 : index
    %c0_2 = arith.constant 0 : index
    %1 = vector.load %arg2[%c0_1, %c0_2] : memref<27x32xbf16, #tpu.memory_space<vmem>>, vector<27x32xbf16>
    %cst = arith.constant dense<0.000000e+00> : vector<512x32xf32>
    %2 = tpu.matmul %0, %1, %cst {dimension_numbers = #tpu.dot_dimension_numbers<[1], [0], [0], [1], [0, 0, 1, 1], [], []>} : vector<512x27xbf16>, vector<27x32xbf16>, vector<512x32xf32> -> vector<512x32xf32>
    %c0_3 = arith.constant 0 : index
    %c0_4 = arith.constant 0 : index
    %3 = vector.load %arg3[%c0_3, %c0_4] : memref<1x32xf32, #tpu.memory_space<vmem>>, vector<1x32xf32>
    %4 = vector.broadcast %3 : vector<1x32xf32> to vector<512x32xf32>
    %5 = arith.addf %2, %4 : vector<512x32xf32>
    %cst_5 = arith.constant 0.000000e+00 : f32
    %6 = vector.broadcast %cst_5 : f32 to vector<512x32xf32>
    %7 = arith.subf %6, %5 : vector<512x32xf32>
    %8 = math.exp %7 : vector<512x32xf32>
    %cst_6 = arith.constant 1.000000e+00 : f32
    %9 = vector.broadcast %cst_6 : f32 to vector<512x32xf32>
    %10 = arith.addf %9, %8 : vector<512x32xf32>
    %11 = tpu.reciprocal %10 {approx = true} : vector<512x32xf32> -> vector<512x32xf32>
    %12 = arith.mulf %5, %11 : vector<512x32xf32>
    %13 = arith.truncf %12 : vector<512x32xf32> to vector<512x32xbf16>
    %c0_7 = arith.constant 0 : index
    %c0_8 = arith.constant 0 : index
    %14 = vector.load %arg4[%c0_7, %c0_8] : memref<512x32xbf16, #tpu.memory_space<vmem>>, vector<512x32xbf16>
    tpu.vector_store %arg4[%c0_7, %c0_8], %13 {strides = array<i32>} : memref<512x32xbf16, #tpu.memory_space<vmem>>, vector<512x32xbf16>,
    return
  }
  func.func @transform_0(%arg0: i32) -> (i32, i32) {
    %c0_i32 = arith.constant 0 : i32
    %c0_i32_0 = arith.constant 0 : i32
    return %arg0, %c0_i32 : i32, i32
  }
  func.func @transform_1(%arg0: i32) -> (i32, i32) {
    %c0_i32 = arith.constant 0 : i32
    %c0_i32_0 = arith.constant 0 : i32
    %c0_i32_1 = arith.constant 0 : i32
    return %c0_i32, %c0_i32_0 : i32, i32
  }
  func.func @transform_2(%arg0: i32) -> (i32, i32) {
    %c0_i32 = arith.constant 0 : i32
    %c0_i32_0 = arith.constant 0 : i32
    %c0_i32_1 = arith.constant 0 : i32
    return %c0_i32, %c0_i32_0 : i32, i32
  }
  func.func @transform_3(%arg0: i32) -> (i32, i32) {
    %c0_i32 = arith.constant 0 : i32
    %c0_i32_0 = arith.constant 0 : i32
    return %arg0, %c0_i32 : i32, i32
  }
}

</mosaic_0001>

<bundles_post_ra>
// kernel: tpu_custom_call.1
= control target key start
LH: loop header
LB: loop body
LE: loop exit
PB: predicated region body
PF: predicated region fallthrough
CT: control target
= control target key end

     0   :  { %s2216_s12 = smov 0   ;;  %s2910_s0 = inlined_call_operand.vmem [shape: bf16[2048,27], index: 0, kind: input, shape index: {}]   ;;  %s2911_s1 = inlined_call_operand.vmem [shape: bf16[27,32], index: 1, kind: input, shape index: {}]   ;;  %s2912_s2 = inlined_call_operand.vmem [shape: f32[1,32], index: 2, kind: input, shape index: {}]   ;;  %s2913_s3 = inlined_call_operand.vmem [shape: bf16[2048,32], index: 3, kind: output, shape index: {}]  }
   0x1 LB: > { %s1575_s13 = sadd.s32 4294967295, %s2193_s12   ;;  %p1579_p0 = scmp.ge.s32.totalorder %s2193_s12, 1  ;;  %s2193_s12 = sphi %s2216_s12, %s13_s12  }
   0x2   : > { %p138_p1 = scmp.lt.s32.totalorder %s2193_s12, 5 }
   0x4   : > { %p139_p2 = pnand %p1579_p0, %p138_p1 }
   0x6   : > { %142 = sbr.rel (%p139_p2) target bundleno = 388 (0x184), region = 32 }
   0xd   : > { %v1896_v0 = vld [vmem:[%s2911_s1] sm:$0xff]   ;;  %vm518_vm0 = vcmask 1044480   ;;  %v1897_v1 = vld [vmem:[%s2911_s1 + $0x8] sm:$0x3f]   ;;  %vm519_vm1 = vcmask 1045504   ;;  %s1580_s18 = sshll.u32 %s1575_s13, 6 }
   0xe   : > { %1815 = vmatprep.subr.bf16.mxu0 %v1896_v0  ;;  %1883 = vmatprep.subr.bf16.mxu1 %v1896_v0  ;;  %v2195_v2 = vmov 65535   ;;  %p163_p3 = scmp.lt.s32.totalorder %s1580_s18, 255  ;;  %vm421_vm2 = vcmask 220160   ;;  %v2307_v38 = vld [vmem:[%s2912_s2] ss:$0 sm:$0xff]  ;;  %vm1454_vm3 = vcmask 257024  }
   0xf   : > { %1816 = vmatpush3.bf16.msra.mxu0 %v1896_v0  ;;  %1885 = vmatpush3.bf16.msra.mxu1 %v1896_v0  ;;  %v520_v3 = vsel %vm518_vm0, 4294967295, %v2195_v2 }
  0x10   : > { %v521_v4 = vsel %vm519_vm1, %v520_v3, 0  ;;  %s2931_s18 = smov (!%p163_p3, %s1580_s18), 255 }
  0x11   : > { %v523_v5 = vand.u32 %v1897_v1, %v521_v4  ;;  %s1581_s19 = sshll.u32 %s2931_s18, 2 }
  0x12   : > { %s2238_s22 = scalar_lea.vmem %s2910_s0, %s1581_s19  ;;  %s2435_s27 = scalar_lea.vmem %s2913_s3, %s1581_s19 }
  0x13   : > { %1817 = vmatprep.subr.bf16.mxu0 %v523_v5  ;;  %1884 = vmatprep.subr.bf16.mxu1 %v523_v5  ;;  %v1898_v6 = vld [vmem:[%s2238_s22] sm:$0xff]   ;;  %v1900_v8 = vld [vmem:[%s2238_s22 + $0x8] sm:$0xff]   ;;  %v1902_v10 = vld [vmem:[%s2238_s22 + $0x10] sm:$0xff]  }
  0x14   : > { %1818 = vmatpush3.bf16.msra.mxu0 %v523_v5  ;;  %1886 = vmatpush3.bf16.msra.mxu1 %v523_v5  ;;  %v1899_v7 = vld [vmem:[%s2238_s22 + $0x80] sm:$0xff]   ;;  %v1901_v9 = vld [vmem:[%s2238_s22 + $0x88] sm:$0xff]   ;;  %v1903_v11 = vld [vmem:[%s2238_s22 + $0x90] sm:$0xff]  }
  0x15   : > { %1819 = vmatprep.mubr.msk.bf16.mxu0 %vm421_vm2, %v1898_v6  ;;  %1851 = vmatprep.mubr.msk.bf16.mxu1 %vm421_vm2, %v1899_v7  ;;  %v1904_v12 = vld [vmem:[%s2238_s22 + $0x18] sm:$0xff]   ;;  %v1906_v14 = vld [vmem:[%s2238_s22 + $0x20] sm:$0xff]   ;;  %v1908_v16 = vld [vmem:[%s2238_s22 + $0x28] sm:$0xff]  }
  0x16   : > { %v1905_v13 = vld [vmem:[%s2238_s22 + $0x98] sm:$0xff]   ;;  %v1907_v15 = vld [vmem:[%s2238_s22 + $0xa0] sm:$0xff]   ;;  %v1909_v17 = vld [vmem:[%s2238_s22 + $0xa8] sm:$0xff]  }
  0x17   : > { %1820 = vmatmul.mubr.msk.bf16.vlgmr.msra.gmra.mrb[0].mxu0 %vm421_vm2, %v1900_v8  ;;  %1852 = vmatmul.mubr.msk.bf16.vlgmr.msra.gmra.mrb[0].mxu1 %vm421_vm2, %v1901_v9  ;;  %v1910_v18 = vld [vmem:[%s2238_s22 + $0x30] sm:$0xff]   ;;  %v1912_v20 = vld [vmem:[%s2238_s22 + $0x38] sm:$0xff]   ;;  %v1914_v22 = vld [vmem:[%s2238_s22 + $0x40] sm:$0xff]  }
  0x18   : > { %1823 = vmatprep.mubr.msk.bf16.mxu0 %vm421_vm2, %v1902_v10  ;;  %1855 = vmatprep.mubr.msk.bf16.mxu1 %vm421_vm2, %v1903_v11  ;;  %v1911_v19 = vld [vmem:[%s2238_s22 + $0xb0] sm:$0xff]   ;;  %v1913_v21 = vld [vmem:[%s2238_s22 + $0xb8] sm:$0xff]   ;;  %v1915_v23 = vld [vmem:[%s2238_s22 + $0xc0] sm:$0xff]  }
  0x19   : > { %v1916_v24 = vld [vmem:[%s2238_s22 + $0x48] sm:$0xff]   ;;  %v1918_v26 = vld [vmem:[%s2238_s22 + $0x50] sm:$0xff]   ;;  %v1920_v28 = vld [vmem:[%s2238_s22 + $0x58] sm:$0xff]  }
  0x1a   : > { %v1917_v25 = vld [vmem:[%s2238_s22 + $0xc8] sm:$0xff]   ;;  %v1919_v27 = vld [vmem:[%s2238_s22 + $0xd0] sm:$0xff]   ;;  %v1921_v29 = vld [vmem:[%s2238_s22 + $0xd8] sm:$0xff]  }
  0x1b   : > { %v1922_v30 = vld [vmem:[%s2238_s22 + $0x60] sm:$0xff]   ;;  %v1924_v32 = vld [vmem:[%s2238_s22 + $0x68] sm:$0xff]   ;;  %v1926_v34 = vld [vmem:[%s2238_s22 + $0x70] sm:$0xff]  }
  0x1c   : > { %v1923_v31 = vld [vmem:[%s2238_s22 + $0xe0] sm:$0xff]   ;;  %v1925_v33 = vld [vmem:[%s2238_s22 + $0xe8] sm:$0xff]   ;;  %v1927_v35 = vld [vmem:[%s2238_s22 + $0xf0] sm:$0xff]  }
  0x1d   : > { %v1928_v36 = vld [vmem:[%s2238_s22 + $0x78] sm:$0xff]  }
  0x1e   : > { %v1929_v37 = vld [vmem:[%s2238_s22 + $0xf8] sm:$0xff]  }
  0x1f   : > { %1824 = vmatmul.mubr.msk.bf16.gmra.mrb[4].mxu0 %vm421_vm2, %v1904_v12  ;;  %1856 = vmatmul.mubr.msk.bf16.gmra.mrb[4].mxu1 %vm421_vm2, %v1905_v13 }
  0x20   : > { %1827 = vmatprep.mubr.msk.bf16.mxu0 %vm421_vm2, %v1906_v14  ;;  %1859 = vmatprep.mubr.msk.bf16.mxu1 %vm421_vm2, %v1907_v15 }
  0x27   : > { %1828 = vmatmul.mubr.msk.bf16.gmra.mrb[8].mxu0 %vm421_vm2, %v1908_v16  ;;  %1860 = vmatmul.mubr.msk.bf16.gmra.mrb[8].mxu1 %vm421_vm2, %v1909_v17 }
  0x28   : > { %1831 = vmatprep.mubr.msk.bf16.mxu0 %vm421_vm2, %v1910_v18  ;;  %1863 = vmatprep.mubr.msk.bf16.mxu1 %vm421_vm2, %v1911_v19 }
  0x2f   : > { %1832 = vmatmul.mubr.msk.bf16.gmra.mrb[12].mxu0 %vm421_vm2, %v1912_v20  ;;  %1864 = vmatmul.mubr.msk.bf16.gmra.mrb[12].mxu1 %vm421_vm2, %v1913_v21 }
  0x30   : > { %1835 = vmatprep.mubr.msk.bf16.mxu0 %vm421_vm2, %v1914_v22  ;;  %1867 = vmatprep.mubr.msk.bf16.mxu1 %vm421_vm2, %v1915_v23 }
  0x37   : > { %1836 = vmatmul.mubr.msk.bf16.gmra.mrb[16].mxu0 %vm421_vm2, %v1916_v24  ;;  %1868 = vmatmul.mubr.msk.bf16.gmra.mrb[16].mxu1 %vm421_vm2, %v1917_v25 }
  0x38   : > { %1839 = vmatprep.mubr.msk.bf16.mxu0 %vm421_vm2, %v1918_v26  ;;  %1871 = vmatprep.mubr.msk.bf16.mxu1 %vm421_vm2, %v1919_v27 }
  0x3f   : > { %1840 = vmatmul.mubr.msk.bf16.gmra.mrb[20].mxu0 %vm421_vm2, %v1920_v28  ;;  %1872 = vmatmul.mubr.msk.bf16.gmra.mrb[20].mxu1 %vm421_vm2, %v1921_v29 }
  0x40   : > { %1843 = vmatprep.mubr.msk.bf16.mxu0 %vm421_vm2, %v1922_v30  ;;  %1875 = vmatprep.mubr.msk.bf16.mxu1 %vm421_vm2, %v1923_v31 }
  0x47   : > { %1844 = vmatmul.mubr.msk.bf16.gmra.mrb[24].mxu0 %vm421_vm2, %v1924_v32  ;;  %1876 = vmatmul.mubr.msk.bf16.gmra.mrb[24].mxu1 %vm421_vm2, %v1925_v33 }
  0x48   : > { %1847 = vmatprep.mubr.msk.bf16.mxu0 %vm421_vm2, %v1926_v34  ;;  %1879 = vmatprep.mubr.msk.bf16.mxu1 %vm421_vm2, %v1927_v35 }
  0x4f   : > { %1848 = vmatmul.mubr.msk.bf16.gmra.mrb[28].mxu0 %vm421_vm2, %v1928_v36  ;;  %1880 = vmatmul.mubr.msk.bf16.gmra.mrb[28].mxu1 %vm421_vm2, %v1929_v37 }
  0xea   : > { %v1821_v39 = vpop.f32.mrb[0].mxu0  ;;  %v1853_v41 = vpop.f32.mrb[0].mxu1 }
  0xeb   : > { %v2310_v40 = vadd.f32 %v1821_v39, %v2307_v38  ;;  %v559_v42 = vpop.f32.mrb[1].mxu0  ;;  %v2313_v43 = vadd.f32 %v1853_v41, %v2307_v38  ;;  %v687_v45 = vpop.f32.mrb[1].mxu1 }
  0xec   : > { %v2316_v44 = vadd.f32 %v2307_v38, %v559_v42  ;;  %v1822_v46 = vpop.f32.mrb[2].mxu0  ;;  %v2320_v48 = vadd.f32 %v2307_v38, %v687_v45  ;;  %v1854_v50 = vpop.f32.mrb[2].mxu1 }
  0xed   : > { %v816_v47 = vsub.f32 0.0, %v2310_v40  ;;  %v2323_v49 = vadd.f32 %v1822_v46, %v2307_v38  ;;  %v562_v51 = vpop.f32.mrb[3].mxu0  ;;  %v848_v52 = vsub.f32 0.0, %v2313_v43  ;;  %v2328_v54 = vadd.f32 %v1854_v50, %v2307_v38  ;;  %v690_v56 = vpop.f32.mrb[3].mxu1 }
  0xee   : > { %v814_v53 = vsub.f32 0.0, %v2316_v44  ;;  %v2331_v55 = vadd.f32 %v2307_v38, %v562_v51  ;;  %v846_v58 = vsub.f32 0.0, %v2320_v48  ;;  %v2336_v60 = vadd.f32 %v2307_v38, %v690_v56 }
  0xef   : > { %v882_v57 = vmul.f32 1.442695, %v816_v47  ;;  %v817_v59 = vsub.f32 0.0, %v2323_v49  ;;  %v946_v61 = vmul.f32 1.442695, %v848_v52  ;;  %v849_v63 = vsub.f32 0.0, %v2328_v54 }
  0xf0   : > { %v878_v62 = vmul.f32 1.442695, %v814_v53  ;;  %v815_v0 = vsub.f32 0.0, %v2331_v55  ;;  %v942_v1 = vmul.f32 1.442695, %v846_v58  ;;  %v847_v3 = vsub.f32 0.0, %v2336_v60 }
  0xf1   : > { %1930 = vpow2.f32 %v882_v57  ;;  %v884_v2 = vmul.f32 1.442695, %v817_v59  ;;  %v948_v4 = vmul.f32 1.442695, %v849_v63 }
  0xf2   : > { %1932 = vpow2.f32 %v946_v61  ;;  %v1825_v5 = vpop.f32.mrb[4].mxu0  ;;  %v880_v6 = vmul.f32 1.442695, %v815_v0  ;;  %v1857_v8 = vpop.f32.mrb[4].mxu1  ;;  %v944_v10 = vmul.f32 1.442695, %v847_v3 }
  0xf3   : > { %1934 = vpow2.f32 %v878_v62  ;;  %v2342_v7 = vadd.f32 %v1825_v5, %v2307_v38  ;;  %v575_v9 = vpop.f32.mrb[5].mxu0  ;;  %v2345_v11 = vadd.f32 %v1857_v8, %v2307_v38  ;;  %v703_v13 = vpop.f32.mrb[5].mxu1 }
  0xf4   : > { %1936 = vpow2.f32 %v942_v1  ;;  %v2348_v12 = vadd.f32 %v2307_v38, %v575_v9  ;;  %v1826_v14 = vpop.f32.mrb[6].mxu0  ;;  %v2352_v16 = vadd.f32 %v2307_v38, %v703_v13  ;;  %v1858_v18 = vpop.f32.mrb[6].mxu1 }
  0xf5   : > { %1938 = vpow2.f32 %v884_v2  ;;  %v820_v15 = vsub.f32 0.0, %v2342_v7  ;;  %v2355_v17 = vadd.f32 %v1826_v14, %v2307_v38  ;;  %v578_v19 = vpop.f32.mrb[7].mxu0  ;;  %v852_v20 = vsub.f32 0.0, %v2345_v11  ;;  %v706_v23 = vpop.f32.mrb[7].mxu1 }
  0xf6   : > { %1940 = vpow2.f32 %v948_v4  ;;  %v818_v21 = vsub.f32 0.0, %v2348_v12  ;;  %v2360_v22 = vadd.f32 %v1858_v18, %v2307_v38  ;;  %v850_v25 = vsub.f32 0.0, %v2352_v16 }
  0xf7   : > { %1942 = vpow2.f32 %v880_v6  ;;  %v890_v24 = vmul.f32 1.442695, %v820_v15  ;;  %v821_v26 = vsub.f32 0.0, %v2355_v17  ;;  %v954_v27 = vmul.f32 1.442695, %v852_v20 }
  0xf8   : > { %1944 = vpow2.f32 %v944_v10  ;;  %v886_v28 = vmul.f32 1.442695, %v818_v21  ;;  %v950_v29 = vmul.f32 1.442695, %v850_v25  ;;  %v853_v31 = vsub.f32 0.0, %v2360_v22 }
  0xf9   : > { %1946 = vpow2.f32 %v890_v24  ;;  %v892_v30 = vmul.f32 1.442695, %v821_v26  ;;  %v2366_v32 = vadd.f32 %v2307_v38, %v578_v19  ;;  %v2369_v35 = vadd.f32 %v2307_v38, %v706_v23 }
  0xfa   : > { %1948 = vpow2.f32 %v954_v27  ;;  %v1829_v33 = vpop.f32.mrb[8].mxu0  ;;  %v1861_v36 = vpop.f32.mrb[8].mxu1  ;;  %v2377_v58 = vmul.f32 1.442695, %v853_v31 }
  0xfb   : > { %v1931_v34 = vpop.eup %1930  ;;  %1950 = vpow2.f32 %v886_v28  ;;  %v591_v37 = vpop.f32.mrb[9].mxu0  ;;  %v2372_v42 = vadd.f32 %v1829_v33, %v2307_v38  ;;  %v2375_v51 = vadd.f32 %v1861_v36, %v2307_v38  ;;  %v819_v59 = vsub.f32 0.0, %v2366_v32 }
  0xfc   : > { %v1933_v39 = vpop.eup %1932  ;;  %v1008_v41 = vadd.f32 1.0, %v1931_v34  ;;  %1952 = vpow2.f32 %v950_v29  ;;  %v719_v45 = vpop.f32.mrb[9].mxu1  ;;  %v851_v0 = vsub.f32 0.0, %v2369_v35  ;;  %v2382_v1 = vadd.f32 %v2307_v38, %v591_v37 }
  0xfd   : > { %v1830_v46 = vpop.f32.mrb[10].mxu0  ;;  %v1935_v47 = vpop.eup %1934  ;;  %v1040_v50 = vadd.f32 1.0, %v1933_v39  ;;  %1954 = vpow2.f32 %v892_v30  ;;  %v824_v4 = vsub.f32 0.0, %v2372_v42  ;;  %v2386_v5 = vadd.f32 %v2307_v38, %v719_v45 }
  0xfe   : > { %v1862_v52 = vpop.f32.mrb[10].mxu1  ;;  %v594_v53 = vpop.f32.mrb[11].mxu0  ;;  %1956 = vrcp.f32 %v1008_v41  ;;  %v1006_v57 = vadd.f32 1.0, %v1935_v47  ;;  %v856_v9 = vsub.f32 0.0, %v2375_v51  ;;  %v2390_v10 = vadd.f32 %v1830_v46, %v2307_v38 }
  0xff   : > { %v1937_v56 = vpop.eup %1936  ;;  %v722_v61 = vpop.f32.mrb[11].mxu1  ;;  %1958 = vrcp.f32 %v1040_v50  ;;  %v888_v15 = vmul.f32 1.442695, %v819_v59  ;;  %v2393_v18 = vadd.f32 %v1862_v52, %v2307_v38  ;;  %v2395_v23 = vmul.f32 1.442695, %v851_v0 }
 0x100   : > { %v1939_v62 = vpop.eup %1938  ;;  %v1038_v63 = vadd.f32 1.0, %v1937_v56  ;;  %1960 = vrcp.f32 %v1006_v57  ;;  %v822_v24 = vsub.f32 0.0, %v2382_v1  ;;  %v2400_v29 = vmul.f32 1.442695, %v824_v4 }
 0x101   : > { %v1941_v2 = vpop.eup %1940  ;;  %v1009_v3 = vadd.f32 1.0, %v1939_v62  ;;  %v854_v30 = vsub.f32 0.0, %v2386_v5  ;;  %v2407_v37 = vmul.f32 1.442695, %v856_v9  ;;  %v825_v39 = vsub.f32 0.0, %v2390_v10 }
 0x102   : > { %v1943_v6 = vpop.eup %1942  ;;  %1962 = vrcp.f32 %v1038_v63  ;;  %v1041_v8 = vadd.f32 1.0, %v1941_v2  ;;  %v1833_v19 = vpop.f32.mrb[12].mxu0  ;;  %v857_v50 = vsub.f32 0.0, %v2393_v18  ;;  %v2416_v52 = vadd.f32 %v2307_v38, %v594_v53 }
 0x103   : > { %v1945_v13 = vpop.eup %1944  ;;  %1964 = vrcp.f32 %v1009_v3  ;;  %v1007_v14 = vadd.f32 1.0, %v1943_v6  ;;  %v1865_v25 = vpop.f32.mrb[12].mxu1  ;;  %v894_v62 = vmul.f32 1.442695, %v822_v24  ;;  %v2421_v63 = vadd.f32 %v2307_v38, %v722_v61 }
 0x104   : > { %v1947_v20 = vpop.eup %1946  ;;  %1966 = vrcp.f32 %v1041_v8  ;;  %v1039_v21 = vadd.f32 1.0, %v1945_v13  ;;  %v2398_v26 = vpop.f32.mrb[13].mxu0  ;;  %v958_v3 = vmul.f32 1.442695, %v854_v30  ;;  %v2424_v4 = vadd.f32 %v1833_v19, %v2307_v38 }
 0x105   : > { %v1949_v27 = vpop.eup %1948  ;;  %1968 = vrcp.f32 %v1007_v14  ;;  %v1012_v28 = vadd.f32 1.0, %v1947_v20  ;;  %v2403_v31 = vpop.f32.mrb[13].mxu1  ;;  %v900_v8 = vmul.f32 1.442695, %v825_v39  ;;  %v2428_v9 = vadd.f32 %v1865_v25, %v2307_v38 }
 0x106   : > { %v2405_v33 = vpop.f32.mrb[14].mxu0  ;;  %v1951_v34 = vpop.eup %1950  ;;  %1970 = vrcp.f32 %v1039_v21  ;;  %v1044_v36 = vadd.f32 1.0, %v1949_v27  ;;  %v964_v14 = vmul.f32 1.442695, %v857_v50  ;;  %v823_v19 = vsub.f32 0.0, %v2416_v52 }
 0x107   : > { %v2410_v41 = vpop.f32.mrb[14].mxu1  ;;  %v2412_v45 = vpop.f32.mrb[15].mxu0  ;;  %1972 = vrcp.f32 %v1012_v28  ;;  %v1010_v47 = vadd.f32 1.0, %v1951_v34  ;;  %v855_v25 = vsub.f32 0.0, %v2421_v63  ;;  %v860_v50 = vsub.f32 0.0, %v2428_v9 }
 0x108   : > { %v1953_v46 = vpop.eup %1952  ;;  %v2418_v56 = vpop.f32.mrb[15].mxu1  ;;  %1974 = vrcp.f32 %v1044_v36  ;;  %v828_v36 = vsub.f32 0.0, %v2424_v4 }
 0x109   : > { %v1955_v57 = vpop.eup %1954  ;;  %v1042_v59 = vadd.f32 1.0, %v1953_v46  ;;  %1976 = vrcp.f32 %v1010_v47 }
 0x10a   : > { %v1957_v0 = vpop.eup %1956  ;;  %v1013_v2 = vadd.f32 1.0, %v1955_v57  ;;  %v2439_v20 = vpop.f32.mrb[16].mxu0 }
 0x10b   : > { %v1959_v6 = vpop.eup %1958  ;;  %v1136_v53 = vmul.f32 %v1957_v0, %v2310_v40  ;;  %1978 = vrcp.f32 %v1042_v59  ;;  %v2444_v27 = vpop.f32.mrb[16].mxu1 }
 0x10c   : > { %v1961_v13 = vpop.eup %1960  ;;  %v1168_v61 = vmul.f32 %v1959_v6, %v2313_v43  ;;  %1980 = vrcp.f32 %v1013_v2  ;;  %v2446_v28 = vpop.f32.mrb[17].mxu0  ;;  %v896_v2 = vmul.f32 1.442695, %v823_v19  ;;  %v906_v19 = vmul.f32 1.442695, %v828_v36 }
 0x10d   : > { %v1963_v40 = vpop.eup %1962  ;;  %v1719_v21 = vpack.c.bf16 %v1136_v53, %v1136_v53  ;;  %v1134_v24 = vmul.f32 %v1961_v13, %v2316_v44  ;;  %1982 = vpow2.f32 %v2377_v58  ;;  %v2450_v39 = vpop.f32.mrb[17].mxu1  ;;  %v960_v13 = vmul.f32 1.442695, %v855_v25 }
 0x10e   : > { %v1965_v43 = vpop.eup %1964  ;;  %v1751_v30 = vpack.c.bf16 %v1168_v61, %v1168_v61  ;;  %v1166_v34 = vmul.f32 %v1963_v40, %v2320_v48  ;;  %1984 = vpow2.f32 %v888_v15  ;;  %v2452_v46 = vpop.f32.mrb[18].mxu0 }
 0x10f   : > { %v1967_v44 = vpop.eup %1966  ;;  %1457 = vst.msk [vmem:[%s2435_s27 + $0x8] sm:$0xf] %vm1454_vm3, %v1719_v21  ;;  %v1717_v58 = vpack.c.bf16 %v1134_v24, %v1134_v24  ;;  %v1137_v47 = vmul.f32 %v1965_v43, %v2323_v49  ;;  %1986 = vpow2.f32 %v2395_v23  ;;  %v2459_v57 = vpop.f32.mrb[18].mxu1 }
 0x110   : > { %v2461_v48 = vpop.f32.mrb[19].mxu0  ;;  %v1969_v15 = vpop.eup %1968  ;;  %1489 = vst.msk [vmem:[%s2435_s27 + $0x88] sm:$0xf] %vm1454_vm3, %v1751_v30  ;;  %v1749_v59 = vpack.c.bf16 %v1166_v34, %v1166_v34  ;;  %v1169_v0 = vmul.f32 %v1967_v44, %v2328_v54  ;;  %1988 = vpow2.f32 %v2400_v29  ;;  %v2493_v34 = vadd.f32 %v2307_v38, %v2403_v31 }
 0x111   : > { %v2467_v49 = vpop.f32.mrb[19].mxu1  ;;  %v1971_v23 = vpop.eup %1970  ;;  %1455 = vst.msk [vmem:[%s2435_s27] sm:$0xf] %vm1454_vm3, %v1717_v58  ;;  %v1720_v6 = vpack.c.bf16 %v1137_v47, %v1137_v47  ;;  %v1135_v53 = vmul.f32 %v1969_v15, %v2331_v55  ;;  %1990 = vpow2.f32 %v2407_v37  ;;  %v970_v55 = vmul.f32 1.442695, %v860_v50 }
 0x112   : > { %v1973_v61 = vpop.eup %1972  ;;  %1487 = vst.msk [vmem:[%s2435_s27 + $0x80] sm:$0xf] %vm1454_vm3, %v1749_v59  ;;  %v1752_v54 = vpack.c.bf16 %v1169_v0, %v1169_v0  ;;  %v1167_v29 = vmul.f32 %v1971_v23, %v2336_v60  ;;  %1992 = vpow2.f32 %v894_v62  ;;  %v2484_v60 = vadd.f32 %v2307_v38, %v2398_v26  ;;  %v2486_v62 = vpop.f32.mrb[20].mxu0 }
 0x113   : > { %v1975_v40 = vpop.eup %1974  ;;  %1458 = vst.msk [vmem:[%s2435_s27 + $0xc] sm:$0xf] %vm1454_vm3, %v1720_v6  ;;  %v1718_v21 = vpack.c.bf16 %v1135_v53, %v1135_v53  ;;  %v1140_v24 = vmul.f32 %v1973_v61, %v2342_v7  ;;  %1994 = vpow2.f32 %v958_v3 }
 0x114   : > { %v1977_v43 = vpop.eup %1976  ;;  %1490 = vst.msk [vmem:[%s2435_s27 + $0x8c] sm:$0xf] %vm1454_vm3, %v1752_v54  ;;  %v1750_v37 = vpack.c.bf16 %v1167_v29, %v1167_v29  ;;  %v1172_v25 = vmul.f32 %v1975_v40, %v2345_v11  ;;  %1996 = vpow2.f32 %v900_v8  ;;  %v2495_v11 = vpop.f32.mrb[20].mxu1  ;;  %v826_v23 = vsub.f32 0.0, %v2484_v60 }
 0x115   : > { %v1979_v30 = vpop.eup %1978  ;;  %1456 = vst.msk [vmem:[%s2435_s27 + $0x4] sm:$0xf] %vm1454_vm3, %v1718_v21  ;;  %v1723_v7 = vpack.c.bf16 %v1140_v24, %v1140_v24  ;;  %v1138_v3 = vmul.f32 %v1977_v43, %v2348_v12  ;;  %1998 = vpow2.f32 %v964_v14  ;;  %v2497_v8 = vpop.f32.mrb[21].mxu0  ;;  %v2504_v12 = vadd.f32 %v2405_v33, %v2307_v38 }
 0x116   : > { %v1981_v26 = vpop.eup %1980  ;;  %1488 = vst.msk [vmem:[%s2435_s27 + $0x84] sm:$0xf] %vm1454_vm3, %v1750_v37  ;;  %v1755_v36 = vpack.c.bf16 %v1172_v25, %v1172_v25  ;;  %v1170_v44 = vmul.f32 %v1979_v30, %v2352_v16  ;;  %2000 = vpow2.f32 %v896_v2  ;;  %v2506_v14 = vpop.f32.mrb[21].mxu1  ;;  %v2515_v16 = vadd.f32 %v2410_v41, %v2307_v38 }
 0x117   : > { %v2508_v31 = vpop.f32.mrb[22].mxu0  ;;  %v1983_v58 = vpop.eup %1982  ;;  %1461 = vst.msk [vmem:[%s2435_s27 + $0x18] sm:$0xf] %vm1454_vm3, %v1723_v7  ;;  %v1721_v47 = vpack.c.bf16 %v1138_v3, %v1138_v3  ;;  %v1141_v50 = vmul.f32 %v1981_v26, %v2355_v17  ;;  %2002 = vpow2.f32 %v960_v13  ;;  %v858_v13 = vsub.f32 0.0, %v2493_v34 }
 0x118   : > { %v2517_v15 = vpop.f32.mrb[22].mxu1  ;;  %v2519_v33 = vpop.f32.mrb[23].mxu0  ;;  %1493 = vst.msk [vmem:[%s2435_s27 + $0x98] sm:$0xf] %vm1454_vm3, %v1755_v36  ;;  %v1753_v0 = vpack.c.bf16 %v1170_v44, %v1170_v44  ;;  %v1045_v2 = vadd.f32 1.0, %v1983_v58  ;;  %2004 = vpow2.f32 %v906_v19  ;;  %v829_v29 = vsub.f32 0.0, %v2504_v12 }
 0x119   : > { %v1985_v59 = vpop.eup %1984  ;;  %v2524_v17 = vpop.f32.mrb[23].mxu1  ;;  %1459 = vst.msk [vmem:[%s2435_s27 + $0x10] sm:$0xf] %vm1454_vm3, %v1721_v47  ;;  %v1724_v41 = vpack.c.bf16 %v1141_v50, %v1141_v50  ;;  %2006 = vpow2.f32 %v970_v55  ;;  %v2534_v19 = vadd.f32 %v2307_v38, %v2412_v45  ;;  %v861_v24 = vsub.f32 0.0, %v2515_v16 }
 0x11a   : > { %v1987_v6 = vpop.eup %1986  ;;  %v1011_v53 = vadd.f32 1.0, %v1985_v59  ;;  %1491 = vst.msk [vmem:[%s2435_s27 + $0x90] sm:$0xf] %vm1454_vm3, %v1753_v0  ;;  %2008 = vrcp.f32 %v1045_v2  ;;  %v2541_v55 = vadd.f32 %v2307_v38, %v2418_v56  ;;  %v2543_v25 = vmul.f32 1.442695, %v826_v23  ;;  %v2549_v30 = vpop.f32.mrb[24].mxu0 }
 0x11b   : > { %v1989_v61 = vpop.eup %1988  ;;  %v1043_v54 = vadd.f32 1.0, %v1987_v6  ;;  %1462 = vst.msk [vmem:[%s2435_s27 + $0x1c] sm:$0xf] %vm1454_vm3, %v1724_v41  ;;  %v2547_v45 = vadd.f32 %v2439_v20, %v2307_v38  ;;  %v2551_v26 = vmul.f32 1.442695, %v858_v13  ;;  %v2555_v56 = vadd.f32 %v2444_v27, %v2307_v38  ;;  %v2557_v36 = vpop.f32.mrb[24].mxu1 }
 0x11c   : > { %v1991_v40 = vpop.eup %1990  ;;  %2010 = vrcp.f32 %v1011_v53  ;;  %v1016_v21 = vadd.f32 1.0, %v1989_v61  ;;  %v2559_v44 = vpop.f32.mrb[25].mxu0  ;;  %v2561_v20 = vmul.f32 1.442695, %v829_v29  ;;  %v827_v50 = vsub.f32 0.0, %v2534_v19 }
 0x11d   : > { %v1993_v43 = vpop.eup %1992  ;;  %2012 = vrcp.f32 %v1043_v54  ;;  %v1048_v37 = vadd.f32 1.0, %v1991_v40  ;;  %v2564_v59 = vpop.f32.mrb[25].mxu1  ;;  %v2568_v27 = vmul.f32 1.442695, %v861_v24  ;;  %v859_v6 = vsub.f32 0.0, %v2541_v55 }
 0x11e   : > { %v1995_v7 = vpop.eup %1994  ;;  %2014 = vrcp.f32 %v1016_v21  ;;  %v1014_v3 = vadd.f32 1.0, %v1993_v43  ;;  %v2566_v0 = vpop.f32.mrb[26].mxu0  ;;  %v832_v61 = vsub.f32 0.0, %v2547_v45  ;;  %v2576_v54 = vadd.f32 %v2307_v38, %v2446_v28 }
 0x11f   : > { %v1997_v58 = vpop.eup %1996  ;;  %2016 = vrcp.f32 %v1048_v37  ;;  %v1046_v47 = vadd.f32 1.0, %v1995_v7  ;;  %v2571_v41 = vpop.f32.mrb[26].mxu1  ;;  %v864_v43 = vsub.f32 0.0, %v2555_v56  ;;  %v2585_v37 = vadd.f32 %v2307_v38, %v2450_v39 }
 0x120   : > { %v1999_v2 = vpop.eup %1998  ;;  %2018 = vrcp.f32 %v1014_v3  ;;  %v1017_v23 = vadd.f32 1.0, %v1997_v58  ;;  %2914 = vst [vmem:[#allocation2_spill] sm:$0xff] %v2571_v41  ;;  %v2578_v29 = vpop.f32.mrb[27].mxu0  ;;  %v904_v58 = vmul.f32 1.442695, %v827_v50  ;;  %v2589_v28 = vadd.f32 %v2452_v46, %v2307_v38 }
 0x121   : > { %v2001_v53 = vpop.eup %2000  ;;  %2020 = vrcp.f32 %v1046_v47  ;;  %v1049_v13 = vadd.f32 1.0, %v1999_v2  ;;  %2915 = vst [vmem:[#allocation3_spill] sm:$0xff] %v2578_v29  ;;  %v2580_v40 = vpop.f32.mrb[27].mxu1  ;;  %v914_v41 = vmul.f32 1.442695, %v832_v61  ;;  %v2594_v39 = vadd.f32 %v2459_v57, %v2307_v38 }
 0x122   : > { %2916 = vst [vmem:[#allocation4_spill] sm:$0xff] %v2580_v40  ;;  %v2003_v21 = vpop.eup %2002  ;;  %2022 = vrcp.f32 %v1017_v23  ;;  %v1015_v24 = vadd.f32 1.0, %v2001_v53  ;;  %v968_v40 = vmul.f32 1.442695, %v859_v6  ;;  %v830_v23 = vsub.f32 0.0, %v2576_v54  ;;  %v2600_v6 = vpop.f32.mrb[28].mxu1 }
 0x123   : > { %v2005_v7 = vpop.eup %2004  ;;  %2024 = vrcp.f32 %v1049_v13  ;;  %v1047_v3 = vadd.f32 1.0, %v2003_v21  ;;  %v2596_v13 = vpop.f32.mrb[28].mxu0  ;;  %v978_v21 = vmul.f32 1.442695, %v864_v43  ;;  %2918 = vst [vmem:[#allocation6_spill] sm:$0xff] %v2600_v6  ;;  %v833_v57 = vsub.f32 0.0, %v2589_v28 }
 0x124   : > { %v2007_v47 = vpop.eup %2006  ;;  %2026 = vrcp.f32 %v1015_v24  ;;  %v1020_v2 = vadd.f32 1.0, %v2005_v7  ;;  %2917 = vst [vmem:[#allocation5_spill] sm:$0xff] %v2596_v13  ;;  %v862_v24 = vsub.f32 0.0, %v2585_v37  ;;  %v2602_v7 = vpop.f32.mrb[29].mxu0 }
 0x125   : > { %v2009_v53 = vpop.eup %2008  ;;  %2028 = vrcp.f32 %v1047_v3  ;;  %v1052_v29 = vadd.f32 1.0, %v2007_v47  ;;  %2919 = vst [vmem:[#allocation7_spill] sm:$0xff] %v2602_v7  ;;  %v2608_v47 = vadd.f32 %v2307_v38, %v2461_v48  ;;  %v2610_v13 = vpop.f32.mrb[29].mxu1  ;;  %v910_v7 = vmul.f32 1.442695, %v830_v23 }
 0x126   : > { %v2011_v50 = vpop.eup %2010  ;;  %v1173_v46 = vmul.f32 %v2009_v53, %v2360_v22  ;;  %2030 = vrcp.f32 %v1020_v2  ;;  %v2612_v22 = vpop.f32.mrb[30].mxu0 }
 0x127   : > { %v2013_v3 = vpop.eup %2012  ;;  %v1139_v61 = vmul.f32 %v2011_v50, %v2366_v32  ;;  %2032 = vrcp.f32 %v1052_v29  ;;  %2920 = vst [vmem:[#allocation8_spill] sm:$0xff] %v2612_v22  ;;  %v2616_v32 = vpop.f32.mrb[30].mxu1  ;;  %v865_v22 = vsub.f32 0.0, %v2594_v39 }
 0x128   : > { %v2015_v43 = vpop.eup %2014  ;;  %v1756_v2 = vpack.c.bf16 %v1173_v46, %v1173_v46  ;;  %v1171_v53 = vmul.f32 %v2013_v3, %v2369_v35  ;;  %2034 = vpow2.f32 %v2543_v25  ;;  %v2618_v29 = vpop.f32.mrb[31].mxu0  ;;  %v974_v3 = vmul.f32 1.442695, %v862_v24 }
 0x129   : > { %v2017_v50 = vpop.eup %2016  ;;  %v1722_v48 = vpack.c.bf16 %v1139_v61, %v1139_v61  ;;  %v1144_v6 = vmul.f32 %v2015_v43, %v2372_v42  ;;  %2036 = vpow2.f32 %v2551_v26  ;;  %v2623_v46 = vpop.f32.mrb[31].mxu1  ;;  %v831_v43 = vsub.f32 0.0, %v2608_v47 }
 0x12a   : > { %2921 = vst [vmem:[#allocation9_spill] sm:$0xff] %v2623_v46  ;;  %v2019_v35 = vpop.eup %2018  ;;  %1494 = vst.msk [vmem:[%s2435_s27 + $0x9c] sm:$0xf] %vm1454_vm3, %v1756_v2  ;;  %v1754_v25 = vpack.c.bf16 %v1171_v53, %v1171_v53  ;;  %v1176_v23 = vmul.f32 %v2017_v50, %v2375_v51  ;;  %2038 = vpow2.f32 %v2561_v20  ;;  %v916_v20 = vmul.f32 1.442695, %v833_v57 }
 0x12b   : > { %v2021_v61 = vpop.eup %2020  ;;  %1460 = vst.msk [vmem:[%s2435_s27 + $0x14] sm:$0xf] %vm1454_vm3, %v1722_v48  ;;  %v1727_v42 = vpack.c.bf16 %v1144_v6, %v1144_v6  ;;  %v1142_v26 = vmul.f32 %v2019_v35, %v2382_v1  ;;  %2040 = vpow2.f32 %v2568_v27  ;;  %v980_v27 = vmul.f32 1.442695, %v865_v22 }
 0x12c   : > { %v2023_v46 = vpop.eup %2022  ;;  %1492 = vst.msk [vmem:[%s2435_s27 + $0x94] sm:$0xf] %vm1454_vm3, %v1754_v25  ;;  %v1759_v2 = vpack.c.bf16 %v1176_v23, %v1176_v23  ;;  %v1174_v51 = vmul.f32 %v2021_v61, %v2386_v5  ;;  %2042 = vpow2.f32 %v904_v58  ;;  %v2645_v5 = vadd.f32 %v2307_v38, %v2467_v49 }
 0x12d   : > { %v2025_v24 = vpop.eup %2024  ;;  %1465 = vst.msk [vmem:[%s2435_s27 + $0x28] sm:$0xf] %vm1454_vm3, %v1727_v42  ;;  %v1725_v6 = vpack.c.bf16 %v1142_v26, %v1142_v26  ;;  %v1145_v1 = vmul.f32 %v2023_v46, %v2390_v10  ;;  %2044 = vpow2.f32 %v968_v40  ;;  %v912_v40 = vmul.f32 1.442695, %v831_v43 }
 0x12e   : > { %v2027_v53 = vpop.eup %2026  ;;  %1497 = vst.msk [vmem:[%s2435_s27 + $0xa8] sm:$0xf] %vm1454_vm3, %v1759_v2  ;;  %v1757_v50 = vpack.c.bf16 %v1174_v51, %v1174_v51  ;;  %v1177_v48 = vmul.f32 %v2025_v24, %v2393_v18  ;;  %2046 = vpow2.f32 %v914_v41  ;;  %v2655_v49 = vadd.f32 %v2486_v62, %v2307_v38 }
 0x12f   : > { %v2029_v58 = vpop.eup %2028  ;;  %1463 = vst.msk [vmem:[%s2435_s27 + $0x20] sm:$0xf] %vm1454_vm3, %v1725_v6  ;;  %v1728_v57 = vpack.c.bf16 %v1145_v1, %v1145_v1  ;;  %v1143_v10 = vmul.f32 %v2027_v53, %v2416_v52  ;;  %2048 = vpow2.f32 %v978_v21  ;;  %v2677_v51 = vadd.f32 %v2307_v38, %v2497_v8 }
 0x130   : > { %v2031_v22 = vpop.eup %2030  ;;  %1495 = vst.msk [vmem:[%s2435_s27 + $0xa0] sm:$0xf] %vm1454_vm3, %v1757_v50  ;;  %v1760_v46 = vpack.c.bf16 %v1177_v48, %v1177_v48  ;;  %v1175_v18 = vmul.f32 %v2029_v58, %v2421_v63  ;;  %2050 = vpow2.f32 %v910_v7  ;;  %v863_v63 = vsub.f32 0.0, %v2645_v5 }
 0x131   : > { %v2033_v41 = vpop.eup %2032  ;;  %1466 = vst.msk [vmem:[%s2435_s27 + $0x2c] sm:$0xf] %vm1454_vm3, %v1728_v57  ;;  %v1726_v35 = vpack.c.bf16 %v1143_v10, %v1143_v10  ;;  %v1148_v52 = vmul.f32 %v2031_v22, %v2424_v4  ;;  %2052 = vpow2.f32 %v974_v3  ;;  %v2668_v4 = vadd.f32 %v2495_v11, %v2307_v38 }
 0x132   : > { %v2035_v21 = vpop.eup %2034  ;;  %1498 = vst.msk [vmem:[%s2435_s27 + $0xac] sm:$0xf] %vm1454_vm3, %v1760_v46  ;;  %v1758_v25 = vpack.c.bf16 %v1175_v18, %v1175_v18  ;;  %v1180_v23 = vmul.f32 %v2033_v41, %v2428_v9  ;;  %2054 = vpow2.f32 %v916_v20  ;;  %v836_v26 = vsub.f32 0.0, %v2655_v49 }
 0x133   : > { %v2037_v62 = vpop.eup %2036  ;;  %1464 = vst.msk [vmem:[%s2435_s27 + $0x24] sm:$0xf] %vm1454_vm3, %v1726_v35  ;;  %v1731_v7 = vpack.c.bf16 %v1148_v52, %v1148_v52  ;;  %v1018_v61 = vadd.f32 1.0, %v2035_v21  ;;  %2056 = vpow2.f32 %v980_v27  ;;  %v2683_v24 = vadd.f32 %v2307_v38, %v2506_v14 }
 0x134   : > { %v2039_v3 = vpop.eup %2038  ;;  %1496 = vst.msk [vmem:[%s2435_s27 + $0xa4] sm:$0xf] %vm1454_vm3, %v1758_v25  ;;  %v1763_v42 = vpack.c.bf16 %v1180_v23, %v1180_v23  ;;  %v1050_v9 = vadd.f32 1.0, %v2037_v62  ;;  %2058 = vpow2.f32 %v912_v40  ;;  %v2687_v6 = vadd.f32 %v2508_v31, %v2307_v38 }
 0x135   : > { %v2041_v43 = vpop.eup %2040  ;;  %1469 = vst.msk [vmem:[%s2435_s27 + $0x38] sm:$0xf] %vm1454_vm3, %v1731_v7  ;;  %2060 = vrcp.f32 %v1018_v61  ;;  %v1021_v2 = vadd.f32 1.0, %v2039_v3  ;;  %v976_v53 = vmul.f32 1.442695, %v863_v63  ;;  %v2691_v8 = vadd.f32 %v2517_v15, %v2307_v38 }
 0x136   : > { %v2043_v20 = vpop.eup %2042  ;;  %1501 = vst.msk [vmem:[%s2435_s27 + $0xb8] sm:$0xf] %vm1454_vm3, %v1763_v42  ;;  %2062 = vrcp.f32 %v1050_v9  ;;  %v1053_v11 = vadd.f32 1.0, %v2041_v43  ;;  %v922_v58 = vmul.f32 1.442695, %v836_v26  ;;  %v868_v57 = vsub.f32 0.0, %v2668_v4 }
 0x137   : > { %v2045_v1 = vpop.eup %2044  ;;  %2064 = vrcp.f32 %v1021_v2  ;;  %v1019_v27 = vadd.f32 1.0, %v2043_v20  ;;  %v834_v31 = vsub.f32 0.0, %v2677_v51  ;;  %v2697_v40 = vadd.f32 %v2307_v38, %v2519_v33 }
 0x138   : > { %v2047_v50 = vpop.eup %2046  ;;  %2066 = vrcp.f32 %v1053_v11  ;;  %v1051_v48 = vadd.f32 1.0, %v2045_v1  ;;  %v866_v15 = vsub.f32 0.0, %v2683_v24  ;;  %v837_v18 = vsub.f32 0.0, %v2687_v6 }
 0x139   : > { %v2049_v14 = vpop.eup %2048  ;;  %2068 = vrcp.f32 %v1019_v27  ;;  %v1024_v10 = vadd.f32 1.0, %v2047_v50  ;;  %v869_v52 = vsub.f32 0.0, %v2691_v8  ;;  %v2704_v21 = vadd.f32 %v2307_v38, %v2524_v17 }
 0x13a   : > { %v2051_v22 = vpop.eup %2050  ;;  %2070 = vrcp.f32 %v1051_v48  ;;  %v1056_v46 = vadd.f32 1.0, %v2049_v14  ;;  %v986_v23 = vmul.f32 1.442695, %v868_v57  ;;  %v835_v63 = vsub.f32 0.0, %v2697_v40 }
 0x13b   : > { %v2053_v41 = vpop.eup %2052  ;;  %2072 = vrcp.f32 %v1024_v10  ;;  %v1022_v35 = vadd.f32 1.0, %v2051_v22  ;;  %v918_v61 = vmul.f32 1.442695, %v834_v31  ;;  %v2709_v3 = vadd.f32 %v2549_v30, %v2307_v38 }
 0x13c   : > { %v2055_v25 = vpop.eup %2054  ;;  %2074 = vrcp.f32 %v1056_v46  ;;  %v1054_v33 = vadd.f32 1.0, %v2053_v41  ;;  %v982_v26 = vmul.f32 1.442695, %v866_v15  ;;  %v924_v17 = vmul.f32 1.442695, %v837_v18 }
 0x13d   : > { %v2057_v62 = vpop.eup %2056  ;;  %2076 = vrcp.f32 %v1022_v35  ;;  %v1025_v7 = vadd.f32 1.0, %v2055_v25  ;;  %v988_v20 = vmul.f32 1.442695, %v869_v52  ;;  %v867_v11 = vsub.f32 0.0, %v2704_v21 }
 0x13e   : > { %v2059_v42 = vpop.eup %2058  ;;  %2078 = vrcp.f32 %v1054_v33  ;;  %v1057_v9 = vadd.f32 1.0, %v2057_v62  ;;  %v920_v50 = vmul.f32 1.442695, %v835_v63  ;;  %v2715_v30 = vadd.f32 %v2557_v36, %v2307_v38 }
 0x13f   : > { %v2061_v43 = vpop.eup %2060  ;;  %2080 = vrcp.f32 %v1025_v7  ;;  %v1023_v2 = vadd.f32 1.0, %v2059_v42  ;;  %v840_v14 = vsub.f32 0.0, %v2709_v3  ;;  %v2721_v10 = vadd.f32 %v2307_v38, %v2559_v44 }
 0x140   : > { %v2063_v1 = vpop.eup %2062  ;;  %v1146_v27 = vmul.f32 %v2061_v43, %v2484_v60  ;;  %2082 = vrcp.f32 %v1057_v9  ;;  %v2726_v36 = vadd.f32 %v2307_v38, %v2564_v59  ;;  %v984_v18 = vmul.f32 1.442695, %v867_v11 }
 0x141   : > { %v2065_v48 = vpop.eup %2064  ;;  %v1178_v57 = vmul.f32 %v2063_v1, %v2493_v34  ;;  %2084 = vrcp.f32 %v1023_v2  ;;  %v930_v63 = vmul.f32 1.442695, %v840_v14 }
 0x142   : > { %v2067_v31 = vpop.eup %2066  ;;  %v1729_v22 = vpack.c.bf16 %v1146_v27, %v1146_v27  ;;  %v1149_v60 = vmul.f32 %v2065_v48, %v2504_v12  ;;  %2086 = vpow2.f32 %v976_v53  ;;  %v872_v12 = vsub.f32 0.0, %v2715_v30 }
 0x143   : > { %v2069_v46 = vpop.eup %2068  ;;  %v1761_v15 = vpack.c.bf16 %v1178_v57, %v1178_v57  ;;  %v1181_v34 = vmul.f32 %v2067_v31, %v2515_v16  ;;  %2088 = vpow2.f32 %v922_v58  ;;  %v838_v16 = vsub.f32 0.0, %v2721_v10  ;;  %v2922_v31 = vld [vmem:[#allocation2_spill] sm:$0xff] }
 0x144   : > { %v2071_v41 = vpop.eup %2070  ;;  %1467 = vst.msk [vmem:[%s2435_s27 + $0x30] sm:$0xf] %vm1454_vm3, %v1729_v22  ;;  %v1732_v44 = vpack.c.bf16 %v1149_v60, %v1149_v60  ;;  %v1147_v35 = vmul.f32 %v2069_v46, %v2534_v19  ;;  %2090 = vpow2.f32 %v986_v23  ;;  %v870_v25 = vsub.f32 0.0, %v2726_v36 }
 0x145   : > { %v2073_v53 = vpop.eup %2072  ;;  %1499 = vst.msk [vmem:[%s2435_s27 + $0xb0] sm:$0xf] %vm1454_vm3, %v1761_v15  ;;  %v1764_v38 = vpack.c.bf16 %v1181_v34, %v1181_v34  ;;  %v1179_v59 = vmul.f32 %v2071_v41, %v2541_v55  ;;  %2092 = vpow2.f32 %v918_v61  ;;  %v2923_v15 = vld [vmem:[#allocation3_spill] sm:$0xff]  ;;  %v2924_v41 = vld [vmem:[#allocation4_spill] sm:$0xff] }
 0x146   : > { %v2075_v58 = vpop.eup %2074  ;;  %1470 = vst.msk [vmem:[%s2435_s27 + $0x3c] sm:$0xf] %vm1454_vm3, %v1732_v44  ;;  %v1730_v52 = vpack.c.bf16 %v1147_v35, %v1147_v35  ;;  %v1152_v19 = vmul.f32 %v2073_v53, %v2547_v45  ;;  %2094 = vpow2.f32 %v982_v26  ;;  %v994_v45 = vmul.f32 1.442695, %v872_v12 }
 0x147   : > { %v2077_v33 = vpop.eup %2076  ;;  %1502 = vst.msk [vmem:[%s2435_s27 + $0xbc] sm:$0xf] %vm1454_vm3, %v1764_v38  ;;  %v1762_v23 = vpack.c.bf16 %v1179_v59, %v1179_v59  ;;  %v1184_v55 = vmul.f32 %v2075_v58, %v2555_v56  ;;  %2096 = vpow2.f32 %v924_v17  ;;  %v926_v56 = vmul.f32 1.442695, %v838_v16  ;;  %v2925_v38 = vld [vmem:[#allocation5_spill] sm:$0xff] }
 0x148   : > { %v2079_v62 = vpop.eup %2078  ;;  %1468 = vst.msk [vmem:[%s2435_s27 + $0x34] sm:$0xf] %vm1454_vm3, %v1730_v52  ;;  %v1735_v7 = vpack.c.bf16 %v1152_v19, %v1152_v19  ;;  %v1150_v61 = vmul.f32 %v2077_v33, %v2576_v54  ;;  %2098 = vpow2.f32 %v988_v20  ;;  %v990_v54 = vmul.f32 1.442695, %v870_v25  ;;  %v2926_v19 = vld [vmem:[#allocation6_spill] sm:$0xff] }
 0x149   : > { %v2081_v42 = vpop.eup %2080  ;;  %1500 = vst.msk [vmem:[%s2435_s27 + $0xb4] sm:$0xf] %vm1454_vm3, %v1762_v23  ;;  %v1767_v9 = vpack.c.bf16 %v1184_v55, %v1184_v55  ;;  %v1182_v26 = vmul.f32 %v2079_v62, %v2585_v37  ;;  %2100 = vpow2.f32 %v920_v50 }
 0x14a   : > { %v2083_v17 = vpop.eup %2082  ;;  %1473 = vst.msk [vmem:[%s2435_s27 + $0x48] sm:$0xf] %vm1454_vm3, %v1735_v7  ;;  %v1733_v43 = vpack.c.bf16 %v1150_v61, %v1150_v61  ;;  %v1153_v2 = vmul.f32 %v2081_v42, %v2589_v28  ;;  %2102 = vpow2.f32 %v984_v18  ;;  %v2762_v28 = vld [vmem:[%s2912_s2] ss:$0 sm:$0xff] }
 0x14b   : > { %v2085_v20 = vpop.eup %2084  ;;  %1505 = vst.msk [vmem:[%s2435_s27 + $0xc8] sm:$0xf] %vm1454_vm3, %v1767_v9  ;;  %v1765_v11 = vpack.c.bf16 %v1182_v26, %v1182_v26  ;;  %v1185_v1 = vmul.f32 %v2083_v17, %v2594_v39  ;;  %2104 = vpow2.f32 %v930_v63  ;;  %v2766_v48 = vadd.f32 %v2762_v28, %v2566_v0  ;;  %v2927_v63 = vld [vmem:[#allocation7_spill] sm:$0xff] }
 0x14c   : > { %v2087_v37 = vpop.eup %2086  ;;  %1471 = vst.msk [vmem:[%s2435_s27 + $0x40] sm:$0xf] %vm1454_vm3, %v1733_v43  ;;  %v1736_v27 = vpack.c.bf16 %v1153_v2, %v1153_v2  ;;  %v1151_v50 = vmul.f32 %v2085_v20, %v2608_v47  ;;  %2106 = vpow2.f32 %v994_v45  ;;  %v2772_v47 = vadd.f32 %v2762_v28, %v2922_v31 }
 0x14d   : > { %v2089_v39 = vpop.eup %2088  ;;  %1503 = vst.msk [vmem:[%s2435_s27 + $0xc0] sm:$0xf] %vm1454_vm3, %v1765_v11  ;;  %v1768_v57 = vpack.c.bf16 %v1185_v1, %v1185_v1  ;;  %v1055_v14 = vadd.f32 1.0, %v2087_v37  ;;  %2108 = vpow2.f32 %v926_v56  ;;  %v2778_v0 = vadd.f32 %v2762_v28, %v2923_v15 }
 0x14e   : > { %v2091_v22 = vpop.eup %2090  ;;  %1474 = vst.msk [vmem:[%s2435_s27 + $0x4c] sm:$0xf] %vm1454_vm3, %v1736_v27  ;;  %v1734_v60 = vpack.c.bf16 %v1151_v50, %v1151_v50  ;;  %v1028_v46 = vadd.f32 1.0, %v2089_v39  ;;  %2110 = vpow2.f32 %v990_v54  ;;  %v2784_v44 = vadd.f32 %v2762_v28, %v2924_v41 }
 0x14f   : > { %v2093_v34 = vpop.eup %2092  ;;  %1506 = vst.msk [vmem:[%s2435_s27 + $0xcc] sm:$0xf] %vm1454_vm3, %v1768_v57  ;;  %2112 = vrcp.f32 %v1055_v14  ;;  %v1060_v18 = vadd.f32 1.0, %v2091_v22  ;;  %v841_v53 = vsub.f32 0.0, %v2766_v48  ;;  %v2791_v59 = vadd.f32 %v2762_v28, %v2925_v38 }
 0x150   : > { %v2095_v35 = vpop.eup %2094  ;;  %1472 = vst.msk [vmem:[%s2435_s27 + $0x44] sm:$0xf] %vm1454_vm3, %v1734_v60  ;;  %2114 = vrcp.f32 %v1028_v46  ;;  %v1026_v12 = vadd.f32 1.0, %v2093_v34  ;;  %v873_v52 = vsub.f32 0.0, %v2772_v47  ;;  %v2796_v25 = vadd.f32 %v2762_v28, %v2926_v19  ;;  %v2928_v60 = vld [vmem:[#allocation8_spill] sm:$0xff]  ;;  %v2929_v19 = vld [vmem:[#allocation9_spill] sm:$0xff] }
 0x151   : > { %v2097_v16 = vpop.eup %2096  ;;  %2116 = vrcp.f32 %v1060_v18  ;;  %v1058_v58 = vadd.f32 1.0, %v2095_v35  ;;  %v839_v55 = vsub.f32 0.0, %v2778_v0  ;;  %v2801_v62 = vadd.f32 %v2762_v28, %v2927_v63 }
 0x152   : > { %v2099_v33 = vpop.eup %2098  ;;  %2118 = vrcp.f32 %v1026_v12  ;;  %v1029_v23 = vadd.f32 1.0, %v2097_v16  ;;  %v871_v45 = vsub.f32 0.0, %v2784_v44  ;;  %v2806_v42 = vadd.f32 %v2762_v28, %v2610_v13 }
 0x153   : > { %v2101_v7 = vpop.eup %2100  ;;  %2120 = vrcp.f32 %v1058_v58  ;;  %v1061_v61 = vadd.f32 1.0, %v2099_v33  ;;  %v932_v56 = vmul.f32 1.442695, %v841_v53  ;;  %v844_v17 = vsub.f32 0.0, %v2791_v59 }
 0x154   : > { %v2103_v9 = vpop.eup %2102  ;;  %2122 = vrcp.f32 %v1029_v23  ;;  %v1027_v26 = vadd.f32 1.0, %v2101_v7  ;;  %v996_v54 = vmul.f32 1.442695, %v873_v52  ;;  %v876_v20 = vsub.f32 0.0, %v2796_v25 }
 0x155   : > { %v2105_v43 = vpop.eup %2104  ;;  %2124 = vrcp.f32 %v1061_v61  ;;  %v1059_v2 = vadd.f32 1.0, %v2103_v9  ;;  %v928_v37 = vmul.f32 1.442695, %v839_v55  ;;  %v842_v27 = vsub.f32 0.0, %v2801_v62 }
 0x156   : > { %v2107_v11 = vpop.eup %2106  ;;  %2126 = vrcp.f32 %v1027_v26  ;;  %v1032_v1 = vadd.f32 1.0, %v2105_v43  ;;  %v992_v39 = vmul.f32 1.442695, %v871_v45  ;;  %v874_v57 = vsub.f32 0.0, %v2806_v42 }
 0x157   : > { %v2109_v13 = vpop.eup %2108  ;;  %2128 = vrcp.f32 %v1059_v2  ;;  %v1064_v50 = vadd.f32 1.0, %v2107_v11  ;;  %v938_v22 = vmul.f32 1.442695, %v844_v17  ;;  %v2814_v46 = vadd.f32 %v2762_v28, %v2928_v60 }
 0x158   : > { %v2111_v14 = vpop.eup %2110  ;;  %2130 = vrcp.f32 %v1032_v1  ;;  %v1030_v31 = vadd.f32 1.0, %v2109_v13  ;;  %v1002_v18 = vmul.f32 1.442695, %v876_v20  ;;  %v2818_v41 = vadd.f32 %v2762_v28, %v2616_v32 }
 0x159   : > { %v2113_v15 = vpop.eup %2112  ;;  %2132 = vrcp.f32 %v1064_v50  ;;  %v1062_v34 = vadd.f32 1.0, %v2111_v14  ;;  %v934_v53 = vmul.f32 1.442695, %v842_v27  ;;  %v2823_v38 = vadd.f32 %v2762_v28, %v2618_v29 }
 0x15a   : > { %v2115_v35 = vpop.eup %2114  ;;  %v1183_v12 = vmul.f32 %v2113_v15, %v2645_v5  ;;  %2134 = vrcp.f32 %v1030_v31  ;;  %v998_v52 = vmul.f32 1.442695, %v874_v57  ;;  %v2828_v33 = vadd.f32 %v2762_v28, %v2929_v19 }
 0x15b   : > { %v2117_v16 = vpop.eup %2116  ;;  %v1156_v58 = vmul.f32 %v2115_v35, %v2655_v49  ;;  %2136 = vrcp.f32 %v1062_v34  ;;  %v845_v55 = vsub.f32 0.0, %v2814_v46  ;;  %v877_v49 = vsub.f32 0.0, %v2818_v41 }
 0x15c   : > { %v2119_v32 = vpop.eup %2118  ;;  %v1766_v23 = vpack.c.bf16 %v1183_v12, %v1183_v12  ;;  %v1188_v5 = vmul.f32 %v2117_v16, %v2668_v4  ;;  %2138 = vpow2.f32 %v932_v56  ;;  %v843_v4 = vsub.f32 0.0, %v2823_v38 }
 0x15d   : > { %v2121_v29 = vpop.eup %2120  ;;  %v1739_v63 = vpack.c.bf16 %v1156_v58, %v1156_v58  ;;  %v1154_v7 = vmul.f32 %v2119_v32, %v2677_v51  ;;  %2140 = vpow2.f32 %v996_v54  ;;  %v875_v56 = vsub.f32 0.0, %v2828_v33 }
 0x15e   : > { %v2123_v61 = vpop.eup %2122  ;;  %1504 = vst.msk [vmem:[%s2435_s27 + $0xc4] sm:$0xf] %vm1454_vm3, %v1766_v23  ;;  %v1771_v28 = vpack.c.bf16 %v1188_v5, %v1188_v5  ;;  %v1186_v45 = vmul.f32 %v2121_v29, %v2683_v24  ;;  %2142 = vpow2.f32 %v928_v37  ;;  %v940_v2 = vmul.f32 1.442695, %v845_v55 }
 0x15f   : > { %v2125_v9 = vpop.eup %2124  ;;  %1477 = vst.msk [vmem:[%s2435_s27 + $0x58] sm:$0xf] %vm1454_vm3, %v1739_v63  ;;  %v1737_v26 = vpack.c.bf16 %v1154_v7, %v1154_v7  ;;  %v1157_v51 = vmul.f32 %v2123_v61, %v2687_v6  ;;  %2144 = vpow2.f32 %v992_v39  ;;  %v1004_v6 = vmul.f32 1.442695, %v877_v49 }
 0x160   : > { %v2127_v17 = vpop.eup %2126  ;;  %1509 = vst.msk [vmem:[%s2435_s27 + $0xd8] sm:$0xf] %vm1454_vm3, %v1771_v28  ;;  %v1769_v43 = vpack.c.bf16 %v1186_v45, %v1186_v45  ;;  %v1189_v24 = vmul.f32 %v2125_v9, %v2691_v8  ;;  %2146 = vpow2.f32 %v938_v22  ;;  %v936_v8 = vmul.f32 1.442695, %v843_v4 }
 0x161   : > { %v2129_v54 = vpop.eup %2128  ;;  %1475 = vst.msk [vmem:[%s2435_s27 + $0x50] sm:$0xf] %vm1454_vm3, %v1737_v26  ;;  %v1740_v20 = vpack.c.bf16 %v1157_v51, %v1157_v51  ;;  %v1155_v11 = vmul.f32 %v2127_v17, %v2697_v40  ;;  %2148 = vpow2.f32 %v1002_v18  ;;  %v1000_v40 = vmul.f32 1.442695, %v875_v56 }
 0x162   : > { %v2131_v1 = vpop.eup %2130  ;;  %1507 = vst.msk [vmem:[%s2435_s27 + $0xd0] sm:$0xf] %vm1454_vm3, %v1769_v43  ;;  %v1772_v37 = vpack.c.bf16 %v1189_v24, %v1189_v24  ;;  %v1187_v27 = vmul.f32 %v2129_v54, %v2704_v21  ;;  %2150 = vpow2.f32 %v934_v53 }
 0x163   : > { %v2133_v13 = vpop.eup %2132  ;;  %1478 = vst.msk [vmem:[%s2435_s27 + $0x5c] sm:$0xf] %vm1454_vm3, %v1740_v20  ;;  %v1738_v50 = vpack.c.bf16 %v1155_v11, %v1155_v11  ;;  %v1160_v39 = vmul.f32 %v2131_v1, %v2709_v3  ;;  %2152 = vpow2.f32 %v998_v52 }
 0x164   : > { %v2135_v57 = vpop.eup %2134  ;;  %1510 = vst.msk [vmem:[%s2435_s27 + $0xdc] sm:$0xf] %vm1454_vm3, %v1772_v37  ;;  %v1770_v14 = vpack.c.bf16 %v1187_v27, %v1187_v27  ;;  %v1192_v31 = vmul.f32 %v2133_v13, %v2715_v30  ;;  %2154 = vpow2.f32 %v940_v2 }
 0x165   : > { %v2137_v21 = vpop.eup %2136  ;;  %1476 = vst.msk [vmem:[%s2435_s27 + $0x54] sm:$0xf] %vm1454_vm3, %v1738_v50  ;;  %v1743_v22 = vpack.c.bf16 %v1160_v39, %v1160_v39  ;;  %v1158_v60 = vmul.f32 %v2135_v57, %v2721_v10  ;;  %2156 = vpow2.f32 %v1004_v6 }
 0x166   : > { %v2139_v3 = vpop.eup %2138  ;;  %1508 = vst.msk [vmem:[%s2435_s27 + $0xd4] sm:$0xf] %vm1454_vm3, %v1770_v14  ;;  %v1775_v15 = vpack.c.bf16 %v1192_v31, %v1192_v31  ;;  %v1190_v34 = vmul.f32 %v2137_v21, %v2726_v36  ;;  %2158 = vpow2.f32 %v936_v8 }
 0x167   : > { %v2141_v18 = vpop.eup %2140  ;;  %1481 = vst.msk [vmem:[%s2435_s27 + $0x68] sm:$0xf] %vm1454_vm3, %v1743_v22  ;;  %v1741_v30 = vpack.c.bf16 %v1158_v60, %v1158_v60  ;;  %v1033_v35 = vadd.f32 1.0, %v2139_v3  ;;  %2160 = vpow2.f32 %v1000_v40 }
 0x168   : > { %v2143_v12 = vpop.eup %2142  ;;  %1513 = vst.msk [vmem:[%s2435_s27 + $0xe8] sm:$0xf] %vm1454_vm3, %v1775_v15  ;;  %v1773_v10 = vpack.c.bf16 %v1190_v34, %v1190_v34  ;;  %v1065_v53 = vadd.f32 1.0, %v2141_v18 }
 0x169   : > { %v2145_v16 = vpop.eup %2144  ;;  %1479 = vst.msk [vmem:[%s2435_s27 + $0x60] sm:$0xf] %vm1454_vm3, %v1741_v30  ;;  %2162 = vrcp.f32 %v1033_v35  ;;  %v1031_v58 = vadd.f32 1.0, %v2143_v12 }
 0x16a   : > { %v2147_v52 = vpop.eup %2146  ;;  %1511 = vst.msk [vmem:[%s2435_s27 + $0xe0] sm:$0xf] %vm1454_vm3, %v1773_v10  ;;  %2164 = vrcp.f32 %v1065_v53  ;;  %v1063_v36 = vadd.f32 1.0, %v2145_v16 }
 0x16b   : > { %v2149_v19 = vpop.eup %2148  ;;  %2166 = vrcp.f32 %v1031_v58  ;;  %v1036_v32 = vadd.f32 1.0, %v2147_v52 }
 0x16c   : > { %v2151_v23 = vpop.eup %2150  ;;  %2168 = vrcp.f32 %v1063_v36  ;;  %v1068_v5 = vadd.f32 1.0, %v2149_v19 }
 0x16d   : > { %v2153_v55 = vpop.eup %2152  ;;  %2170 = vrcp.f32 %v1036_v32  ;;  %v1034_v29 = vadd.f32 1.0, %v2151_v23 }
 0x16e   : > { %v2155_v63 = vpop.eup %2154  ;;  %2172 = vrcp.f32 %v1068_v5  ;;  %v1066_v7 = vadd.f32 1.0, %v2153_v55 }
 0x16f   : > { %v2157_v49 = vpop.eup %2156  ;;  %2174 = vrcp.f32 %v1034_v29  ;;  %v1037_v61 = vadd.f32 1.0, %v2155_v63 }
 0x170   : > { %v2159_v28 = vpop.eup %2158  ;;  %2176 = vrcp.f32 %v1066_v7  ;;  %v1069_v45 = vadd.f32 1.0, %v2157_v49 }
 0x171   : > { %v2161_v4 = vpop.eup %2160  ;;  %2178 = vrcp.f32 %v1037_v61  ;;  %v1035_v9 = vadd.f32 1.0, %v2159_v28 }
 0x172   : > { %2180 = vrcp.f32 %v1069_v45  ;;  %v1067_v26 = vadd.f32 1.0, %v2161_v4 }
 0x173   : > { %v2163_v51 = vpop.eup %2162  ;;  %2182 = vrcp.f32 %v1035_v9 }
 0x174   : > { %v2165_v56 = vpop.eup %2164  ;;  %v1161_v17 = vmul.f32 %v2163_v51, %v2766_v48  ;;  %2184 = vrcp.f32 %v1067_v26 }
 0x175   : > { %v2167_v43 = vpop.eup %2166  ;;  %v1193_v24 = vmul.f32 %v2165_v56, %v2772_v47 }
 0x176   : > { %v2169_v2 = vpop.eup %2168  ;;  %v1744_v54 = vpack.c.bf16 %v1161_v17, %v1161_v17  ;;  %v1159_v20 = vmul.f32 %v2167_v43, %v2778_v0 }
 0x177   : > { %v2171_v11 = vpop.eup %2170  ;;  %v1776_v6 = vpack.c.bf16 %v1193_v24, %v1193_v24  ;;  %v1191_v1 = vmul.f32 %v2169_v2, %v2784_v44 }
 0x178   : > { %v2173_v37 = vpop.eup %2172  ;;  %1482 = vst.msk [vmem:[%s2435_s27 + $0x6c] sm:$0xf] %vm1454_vm3, %v1744_v54  ;;  %v1742_v27 = vpack.c.bf16 %v1159_v20, %v1159_v20  ;;  %v1164_v48 = vmul.f32 %v2171_v11, %v2791_v59 }
 0x179   : > { %v2175_v8 = vpop.eup %2174  ;;  %1514 = vst.msk [vmem:[%s2435_s27 + $0xec] sm:$0xf] %vm1454_vm3, %v1776_v6  ;;  %v1774_v47 = vpack.c.bf16 %v1191_v1, %v1191_v1  ;;  %v1196_v13 = vmul.f32 %v2173_v37, %v2796_v25 }
 0x17a   : > { %v2177_v0 = vpop.eup %2176  ;;  %1480 = vst.msk [vmem:[%s2435_s27 + $0x64] sm:$0xf] %vm1454_vm3, %v1742_v27  ;;  %v1747_v50 = vpack.c.bf16 %v1164_v48, %v1164_v48  ;;  %v1162_v44 = vmul.f32 %v2175_v8, %v2801_v62 }
 0x17b   : > { %v2179_v39 = vpop.eup %2178  ;;  %1512 = vst.msk [vmem:[%s2435_s27 + $0xe4] sm:$0xf] %vm1454_vm3, %v1774_v47  ;;  %v1779_v40 = vpack.c.bf16 %v1196_v13, %v1196_v13  ;;  %v1194_v59 = vmul.f32 %v2177_v0, %v2806_v42 }
 0x17c   : > { %v2181_v57 = vpop.eup %2180  ;;  %1485 = vst.msk [vmem:[%s2435_s27 + $0x78] sm:$0xf] %vm1454_vm3, %v1747_v50  ;;  %v1745_v25 = vpack.c.bf16 %v1162_v44, %v1162_v44  ;;  %v1165_v14 = vmul.f32 %v2179_v39, %v2814_v46 }
 0x17d   : > { %v2183_v31 = vpop.eup %2182  ;;  %1517 = vst.msk [vmem:[%s2435_s27 + $0xf8] sm:$0xf] %vm1454_vm3, %v1779_v40  ;;  %v1777_v62 = vpack.c.bf16 %v1194_v59, %v1194_v59  ;;  %v1197_v21 = vmul.f32 %v2181_v57, %v2818_v41 }
 0x17e   : > { %v2185_v22 = vpop.eup %2184  ;;  %1483 = vst.msk [vmem:[%s2435_s27 + $0x70] sm:$0xf] %vm1454_vm3, %v1745_v25  ;;  %v1748_v42 = vpack.c.bf16 %v1165_v14, %v1165_v14  ;;  %v1163_v60 = vmul.f32 %v2183_v31, %v2823_v38 }
 0x17f   : > { %1515 = vst.msk [vmem:[%s2435_s27 + $0xf0] sm:$0xf] %vm1454_vm3, %v1777_v62  ;;  %v1780_v3 = vpack.c.bf16 %v1197_v21, %v1197_v21  ;;  %v1195_v15 = vmul.f32 %v2185_v22, %v2828_v33 }
 0x180   : > { %1486 = vst.msk [vmem:[%s2435_s27 + $0x7c] sm:$0xf] %vm1454_vm3, %v1748_v42  ;;  %v1746_v46 = vpack.c.bf16 %v1163_v60, %v1163_v60 }
 0x181   : > { %1518 = vst.msk [vmem:[%s2435_s27 + $0xfc] sm:$0xf] %vm1454_vm3, %v1780_v3  ;;  %v1778_v34 = vpack.c.bf16 %v1195_v15, %v1195_v15 }
 0x182   : > { %1484 = vst.msk [vmem:[%s2435_s27 + $0x74] sm:$0xf] %vm1454_vm3, %v1746_v46 }
 0x183   : > { %1516 = vst.msk [vmem:[%s2435_s27 + $0xf4] sm:$0xf] %vm1454_vm3, %v1778_v34 }
 0x184 PF: > { %s13_s12 = sadd.s32 1, %s2193_s12  }
 0x185   : > { %p10_p4 = scmp.ge.s32.totalorder %s13_s12, 6  }
 0x187   :  { %12 = sbr.rel (!%p10_p4) target bundleno = 1 (0x1), region = 62 }

</bundles_post_ra>
